<compile_context>
chip_gen: v5e
topology: v5e:2x2
jax: 0.10.0
libtpu: 0.0.40
codegen_flags: <defaults>
</compile_context>

<pallas_src>
import jax
import jax.numpy as jnp
import numpy as np
from jax.experimental import pallas as pl
from jax.experimental.pallas import tpu as pltpu


def _conv_attention_kernel(
    xi_ref,    # (9*C, B*HW)  im2col patches: taps*channels on sublanes, B*HW on lanes
    w3_ref,    # (C, 9*C)     3x3 conv weight, transposed for W @ X
    b3_ref,    # (C, 1)       3x3 conv bias (column, broadcasts over lanes)
    wcat_ref,  # (2*C2, C)    [ (w1*s1)^T ; (wr*sr)^T ] stacked on the output dim
    t1_ref,    # (C2, 1)      fused BN1 shift
    t2r_ref,   # (C2, 1)      fused BN2 shift + BN_res shift (merged)
    w2_ref,    # (C2, C2)     (w2*s2)^T
    wp_ref,    # (1, C2)      projection Linear(C2 -> 1) weight
    scal_ref,  # SMEM (3,)    [proj_bias, exp(temp), sm_bias]
    out_ref,   # (B, HW)      lane-dense attention weights
):
    C2 = w2_ref.shape[0]
    B, HW = out_ref.shape

    # ---- query[0]: 3x3 same-conv (+bias, ReLU) as ONE K=9*C matmul ----
    h0 = jnp.maximum(
        jnp.dot(w3_ref[...], xi_ref[...], preferred_element_type=jnp.float32)
        + b3_ref[...], 0.0)                                        # (C, B*HW)

    # ---- Block: relu( BN2(conv2(relu(BN1(conv1 h0)))) + BNr(convr h0) ) ----
    # conv1 and conv_res share h0 -> single concatenated matmul.
    u = jnp.dot(wcat_ref[...], h0, preferred_element_type=jnp.float32)  # (2*C2, B*HW)
    n1 = jnp.maximum(u[:C2] + t1_ref[...], 0.0)                     # (C2, B*HW)
    y = jnp.maximum(
        jnp.dot(w2_ref[...], n1, preferred_element_type=jnp.float32)
        + u[C2:] + t2r_ref[...], 0.0)                               # (C2, B*HW)

    # ---- project: Linear(C2 -> 1) ----
    aw = (jnp.dot(wp_ref[...], y, preferred_element_type=jnp.float32)
          + scal_ref[0]).reshape(B, HW)                             # (B, HW)

    # ---- SpatialSoftmax over the flattened spatial dim (per batch row) ----
    z = scal_ref[1] * jnp.maximum(aw, 0.0) + scal_ref[2]
    m = jnp.max(z, axis=-1, keepdims=True)
    e = jnp.exp(z - m)
    s = jnp.sum(e, axis=-1, keepdims=True)
    r = pl.reciprocal(s, approx=True)
    r = r * (2.0 - s * r)            # one Newton step -> full f32 accuracy
    out_ref[...] = (e * r).astype(out_ref.dtype)


def conv_attention(x_nchw, params):
    """x_nchw: (B, C, H, W) float32.  Returns attention map (B, 1, H, W)."""
    B, C, H, W = x_nchw.shape
    C2 = params["w1"].shape[1]
    HW = H * W

    # ---------- plain-JAX glue: im2col + weight fusion ----------
    x = x_nchw.astype(jnp.float32)
    x_pad = jnp.pad(x, ((0, 0), (0, 0), (1, 1), (1, 1)))            # (B, C, H+2, W+2)
    taps = [x_pad[:, :, dh:dh + H, dw:dw + W]                       # order: dh major, dw minor
            for dh in range(3) for dw in range(3)]
    xi = jnp.stack(taps, axis=1).reshape(B, 9 * C, HW)              # row k = (dh*3+dw)*C + cin
    xi = jnp.transpose(xi, (1, 0, 2)).reshape(9 * C, B * HW)        # lane = b*HW + h*W + w

    w3t = params["w3"].reshape(9 * C, C).T                          # (C, 9*C)
    b3c = params["b3"].reshape(C, 1)
    wcat = jnp.concatenate([params["w1"] * params["s1"],
                            params["wr"] * params["sr"]], axis=1).T  # (2*C2, C)
    t1c = params["t1"].reshape(C2, 1)
    t2rc = (params["t2"] + params["tr"]).reshape(C2, 1)
    w2t = (params["w2"] * params["s2"]).T                           # (C2, C2)
    wp = params["wp"]                                               # (1, C2)
    scal = jnp.stack([params["proj_b"],
                      jnp.exp(params["temp"]),
                      params["sm_bias"]]).astype(jnp.float32)

    vmem = pl.BlockSpec(memory_space=pltpu.MemorySpace.VMEM)
    smem = pl.BlockSpec(memory_space=pltpu.MemorySpace.SMEM)

    out = pl.pallas_call(
        _conv_attention_kernel,
        out_shape=jax.ShapeDtypeStruct((B, HW), jnp.float32),
        in_specs=[vmem, vmem, vmem, vmem, vmem, vmem, vmem, vmem, smem],
        out_specs=vmem,
    )(xi, w3t, b3c, wcat, t1c, t2rc, w2t, wp, scal)

    return out.reshape(B, 1, H, W)


def init_params(key, query_dim, layer_mult=2):
    """Deterministic synthetic parameters matching the module's __init__ shapes."""
    C, C2 = query_dim, query_dim * layer_mult
    keys = iter(jax.random.split(key, 24))

    def nrm(shape, scale):
        return (scale * jax.random.normal(next(keys), shape)).astype(jnp.float32)

    def bn_affine(n):
        gamma = (1.0 + 0.1 * jax.random.normal(next(keys), (n,))).astype(jnp.float32)
        beta = nrm((n,), 0.1)
        mean = nrm((n,), 0.1)
        var = (0.5 + jax.random.uniform(next(keys), (n,))).astype(jnp.float32)
        s = gamma * jax.lax.rsqrt(var + 1e-5)
        t = beta - mean * s
        return s.reshape(1, n), t.reshape(1, n)

    p = {}
    # query[0]: Conv2d(C, C, k=3, padding=1, bias=True); weight stored (kh, kw, Cin, Cout)
    p["w3"] = nrm((3, 3, C, C), 0.25)
    p["b3"] = nrm((1, C), 0.1)
    # FeatureProc -> Block(C, C2): 1x1 convs stored as (Cin, Cout); BNs fused (eval mode)
    p["w1"] = nrm((C, C2), 0.3)
    p["s1"], p["t1"] = bn_affine(C2)
    p["w2"] = nrm((C2, C2), 0.3)
    p["s2"], p["t2"] = bn_affine(C2)
    p["wr"] = nrm((C, C2), 0.3)
    p["sr"], p["tr"] = bn_affine(C2)
    # project: Linear(C2, 1); weight stored as (1, C2)
    p["wp"] = nrm((1, C2), 0.3)
    p["proj_b"] = nrm((), 0.1)
    # SpatialSoftmax scalar parameters (nn.Parameter(0.0) at init; nonzero to exercise path)
    p["temp"] = jnp.float32(0.3)
    p["sm_bias"] = jnp.float32(0.1)
    return p


def reference(x_nchw, p):
    """Pure-JAX reference of the same forward pass (eval-mode BN)."""
    x = jnp.transpose(x_nchw, (0, 2, 3, 1)).astype(jnp.float32)
    B, H, W, C = x.shape
    xp = jnp.pad(x, ((0, 0), (1, 1), (1, 1), (0, 0)))
    acc = jnp.zeros((B, H, W, C), jnp.float32)
    for dh in range(3):
        for dw in range(3):
            acc = acc + jnp.einsum("bhwc,cd->bhwd",
                                   xp[:, dh:dh + H, dw:dw + W, :], p["w3"][dh, dw])
    h0 = jax.nn.relu(acc + p["b3"][0])
    n1 = jax.nn.relu(jnp.einsum("bhwc,cd->bhwd", h0, p["w1"]) * p["s1"][0] + p["t1"][0])
    n2 = jnp.einsum("bhwc,cd->bhwd", n1, p["w2"]) * p["s2"][0] + p["t2"][0]
    r = jnp.einsum("bhwc,cd->bhwd", h0, p["wr"]) * p["sr"][0] + p["tr"][0]
    y = jax.nn.relu(n2 + r)
    aw = jnp.sum(y * p["wp"][0], axis=-1) + p["proj_b"]            # (B, H, W)
    z = jnp.exp(p["temp"]) * jax.nn.relu(aw) + p["sm_bias"]
    att = jax.nn.softmax(z.reshape(B, -1), axis=-1)
    return att.reshape(B, 1, H, W)


if __name__ == "__main__":
    key = jax.random.PRNGKey(0)
    k_x, k_p = jax.random.split(key)

    B, C, H, W = 2, 4, 16, 16                   # query_dim=4, layer_mults=[2]
    x = jax.random.normal(k_x, (B, C, H, W), jnp.float32)
    params = init_params(k_p, query_dim=C, layer_mult=2)

    att = conv_attention(x, params)
    att = jax.block_until_ready(att)

    ref = reference(x, params)
    assert att.shape == (B, 1, H, W)
    np.testing.assert_allclose(np.asarray(att), np.asarray(ref), atol=1e-5, rtol=1e-4)
    assert np.allclose(np.asarray(att).reshape(B, -1).sum(-1), 1.0, atol=1e-5)
    print("KERNEL_OK")
</pallas_src>

<mosaic_0001>
module attributes {stable_mosaic.version = 11 : i64} {
  func.func @_conv_attention_kernel(%arg0: memref<36x512xf32, #tpu.memory_space<vmem>>, %arg1: memref<4x36xf32, #tpu.memory_space<vmem>>, %arg2: memref<4x1xf32, #tpu.memory_space<vmem>>, %arg3: memref<16x4xf32, #tpu.memory_space<vmem>>, %arg4: memref<8x1xf32, #tpu.memory_space<vmem>>, %arg5: memref<8x1xf32, #tpu.memory_space<vmem>>, %arg6: memref<8x8xf32, #tpu.memory_space<vmem>>, %arg7: memref<1x8xf32, #tpu.memory_space<vmem>>, %arg8: memref<3xf32, #tpu.memory_space<smem>>, %arg9: memref<2x256xf32, #tpu.memory_space<vmem>>) attributes {dimension_semantics = [], scalar_prefetch = 0 : i64, scratch_operands = 0 : i64, tpu.core_type = #tpu.core_type<tc>} {
    %c0 = arith.constant 0 : index
    %c0_0 = arith.constant 0 : index
    %0 = vector.load %arg1[%c0, %c0_0] : memref<4x36xf32, #tpu.memory_space<vmem>>, vector<4x36xf32>
    %c0_1 = arith.constant 0 : index
    %c0_2 = arith.constant 0 : index
    %1 = vector.load %arg0[%c0_1, %c0_2] : memref<36x512xf32, #tpu.memory_space<vmem>>, vector<36x512xf32>
    %cst = arith.constant dense<0.000000e+00> : vector<4x512xf32>
    %2 = tpu.matmul %0, %1, %cst {dimension_numbers = #tpu.dot_dimension_numbers<[1], [0], [0], [1], [0, 0, 1, 1], [], []>} : vector<4x36xf32>, vector<36x512xf32>, vector<4x512xf32> -> vector<4x512xf32>
    %c0_3 = arith.constant 0 : index
    %c0_4 = arith.constant 0 : index
    %3 = vector.load %arg2[%c0_3, %c0_4] : memref<4x1xf32, #tpu.memory_space<vmem>>, vector<4x1xf32>
    %4 = vector.broadcast %3 : vector<4x1xf32> to vector<4x512xf32>
    %5 = arith.addf %2, %4 : vector<4x512xf32>
    %cst_5 = arith.constant 0.000000e+00 : f32
    %6 = vector.broadcast %cst_5 : f32 to vector<4x512xf32>
    %7 = arith.maximumf %5, %6 : vector<4x512xf32>
    %c0_6 = arith.constant 0 : index
    %c0_7 = arith.constant 0 : index
    %8 = vector.load %arg3[%c0_6, %c0_7] : memref<16x4xf32, #tpu.memory_space<vmem>>, vector<16x4xf32>
    %cst_8 = arith.constant dense<0.000000e+00> : vector<16x512xf32>
    %9 = tpu.matmul %8, %7, %cst_8 {dimension_numbers = #tpu.dot_dimension_numbers<[1], [0], [0], [1], [0, 0, 1, 1], [], []>} : vector<16x4xf32>, vector<4x512xf32>, vector<16x512xf32> -> vector<16x512xf32>
    %10 = vector.extract_strided_slice %9 {offsets = [0, 0], sizes = [8, 512], strides = [1, 1]} : vector<16x512xf32> to vector<8x512xf32>
    %c0_9 = arith.constant 0 : index
    %c0_10 = arith.constant 0 : index
    %11 = vector.load %arg4[%c0_9, %c0_10] : memref<8x1xf32, #tpu.memory_space<vmem>>, vector<8x1xf32>
    %12 = vector.broadcast %11 : vector<8x1xf32> to vector<8x512xf32>
    %13 = arith.addf %10, %12 : vector<8x512xf32>
    %cst_11 = arith.constant 0.000000e+00 : f32
    %14 = vector.broadcast %cst_11 : f32 to vector<8x512xf32>
    %15 = arith.maximumf %13, %14 : vector<8x512xf32>
    %c0_12 = arith.constant 0 : index
    %c0_13 = arith.constant 0 : index
    %16 = vector.load %arg6[%c0_12, %c0_13] : memref<8x8xf32, #tpu.memory_space<vmem>>, vector<8x8xf32>
    %cst_14 = arith.constant dense<0.000000e+00> : vector<8x512xf32>
    %17 = tpu.matmul %16, %15, %cst_14 {dimension_numbers = #tpu.dot_dimension_numbers<[1], [0], [0], [1], [0, 0, 1, 1], [], []>} : vector<8x8xf32>, vector<8x512xf32>, vector<8x512xf32> -> vector<8x512xf32>
    %18 = vector.extract_strided_slice %9 {offsets = [8, 0], sizes = [8, 512], strides = [1, 1]} : vector<16x512xf32> to vector<8x512xf32>
    %19 = arith.addf %17, %18 : vector<8x512xf32>
    %c0_15 = arith.constant 0 : index
    %c0_16 = arith.constant 0 : index
    %20 = vector.load %arg5[%c0_15, %c0_16] : memref<8x1xf32, #tpu.memory_space<vmem>>, vector<8x1xf32>
    %21 = vector.broadcast %20 : vector<8x1xf32> to vector<8x512xf32>
    %22 = arith.addf %19, %21 : vector<8x512xf32>
    %cst_17 = arith.constant 0.000000e+00 : f32
    %23 = vector.broadcast %cst_17 : f32 to vector<8x512xf32>
    %24 = arith.maximumf %22, %23 : vector<8x512xf32>
    %c0_18 = arith.constant 0 : index
    %c0_19 = arith.constant 0 : index
    %25 = vector.load %arg7[%c0_18, %c0_19] : memref<1x8xf32, #tpu.memory_space<vmem>>, vector<1x8xf32>
    %cst_20 = arith.constant dense<0.000000e+00> : vector<1x512xf32>
    %26 = tpu.matmul %25, %24, %cst_20 {dimension_numbers = #tpu.dot_dimension_numbers<[1], [0], [0], [1], [0, 0, 1, 1], [], []>} : vector<1x8xf32>, vector<8x512xf32>, vector<1x512xf32> -> vector<1x512xf32>
    %c0_21 = arith.constant 0 : index
    %27 = memref.load %arg8[%c0_21] : memref<3xf32, #tpu.memory_space<smem>>
    %28 = vector.broadcast %27 : f32 to vector<1x512xf32>
    %29 = arith.addf %26, %28 : vector<1x512xf32>
    %30 = vector.shape_cast %29 : vector<1x512xf32> to vector<2x256xf32>
    %c1 = arith.constant 1 : index
    %31 = memref.load %arg8[%c1] : memref<3xf32, #tpu.memory_space<smem>>
    %cst_22 = arith.constant 0.000000e+00 : f32
    %32 = vector.broadcast %cst_22 : f32 to vector<2x256xf32>
    %33 = arith.maximumf %30, %32 : vector<2x256xf32>
    %34 = vector.broadcast %31 : f32 to vector<2x256xf32>
    %35 = arith.mulf %34, %33 : vector<2x256xf32>
    %c2 = arith.constant 2 : index
    %36 = memref.load %arg8[%c2] : memref<3xf32, #tpu.memory_space<smem>>
    %37 = vector.broadcast %36 : f32 to vector<2x256xf32>
    %38 = arith.addf %35, %37 : vector<2x256xf32>
    %cst_23 = arith.constant dense<0xFF800000> : vector<2xf32>
    %39 = vector.multi_reduction <maximumf>, %38, %cst_23 [1] : vector<2x256xf32> to vector<2xf32>
    %40 = vector.shape_cast %39 : vector<2xf32> to vector<2x1xf32>
    %41 = vector.broadcast %40 : vector<2x1xf32> to vector<2x256xf32>
    %42 = arith.subf %38, %41 : vector<2x256xf32>
    %43 = math.exp %42 : vector<2x256xf32>
    %cst_24 = arith.constant dense<0.000000e+00> : vector<2xf32>
    %44 = vector.multi_reduction <add>, %43, %cst_24 [1] : vector<2x256xf32> to vector<2xf32>
    %45 = vector.shape_cast %44 : vector<2xf32> to vector<2x1xf32>
    %46 = tpu.reciprocal %45 {approx = true} : vector<2x1xf32> -> vector<2x1xf32>
    %47 = arith.mulf %45, %46 : vector<2x1xf32>
    %cst_25 = arith.constant 2.000000e+00 : f32
    %48 = vector.broadcast %cst_25 : f32 to vector<2x1xf32>
    %49 = arith.subf %48, %47 : vector<2x1xf32>
    %50 = arith.mulf %46, %49 : vector<2x1xf32>
    %51 = vector.broadcast %50 : vector<2x1xf32> to vector<2x256xf32>
    %52 = arith.mulf %43, %51 : vector<2x256xf32>
    %c0_26 = arith.constant 0 : index
    %c0_27 = arith.constant 0 : index
    %53 = vector.load %arg9[%c0_26, %c0_27] : memref<2x256xf32, #tpu.memory_space<vmem>>, vector<2x256xf32>
    tpu.vector_store %arg9[%c0_26, %c0_27], %52 {strides = array<i32>} : memref<2x256xf32, #tpu.memory_space<vmem>>, vector<2x256xf32>,
    return
  }
}

</mosaic_0001>

<bundles_post_ra>
// kernel: tpu_custom_call.1
= control target key start
LH: loop header
LB: loop body
LE: loop exit
PB: predicated region body
PF: predicated region fallthrough
CT: control target
= control target key end

     0   :  { %14 = vsyncpa [#allocation3], 0  ;;  %s823_s0 = inlined_call_operand.hbm [shape: f32[36,512], index: 0, kind: input, shape index: {}]   ;;  %s824_s1 = inlined_call_operand.vmem [shape: f32[4,36], index: 1, kind: input, shape index: {}]   ;;  %s825_s2 = inlined_call_operand.vmem [shape: f32[4,1], index: 2, kind: input, shape index: {}]   ;;  %s826_s3 = inlined_call_operand.vmem [shape: f32[16,4], index: 3, kind: input, shape index: {}]   ;;  %s827_s4 = inlined_call_operand.vmem [shape: f32[8,1], index: 4, kind: input, shape index: {}]   ;;  %s828_s5 = inlined_call_operand.vmem [shape: f32[8,1], index: 5, kind: input, shape index: {}]   ;;  %s829_s6 = inlined_call_operand.vmem [shape: f32[8,8], index: 6, kind: input, shape index: {}]   ;;  %s830_s7 = inlined_call_operand.vmem [shape: f32[1,8], index: 7, kind: input, shape index: {}]   ;;  %s831_s8 = inlined_call_operand.vmem [shape: f32[3], index: 8, kind: input, shape index: {}]   ;;  %s832_s9 = inlined_call_operand.hbm [shape: f32[2,256], index: 9, kind: output, shape index: {}]  }
   0x1   :  { %15 = vsyncpa [#allocation5], 0 }
   0x2   :  { %16 = vsyncpa [#allocation4], 0  ;;  %s21_s11 = sshll.u32 %s823_s0, 4  ;;  %s701_s12 = smov [#allocation2]   ;;  %s22_s11 = int_to_ptr.hbm [resolvable:$true] %s21_s11 }
   0x3   :  { %s23_s13 = sshll.u32 %s701_s12, 4  ;;  %s49_s16 = sshll.u32 %s831_s8, 4  ;;  %s24_s13 = int_to_ptr.vmem [resolvable:$true] %s23_s13  ;;  %s50_s16 = int_to_ptr.vmem [resolvable:$true] %s49_s16 }
   0x4   :  { %s702_s17 = smov 512   ;;  %s703_s18 = smov 32  }
   0x5   :  { %29 = dma.hbm_to_vmem [thread:$0]  %s22_s11, 2560, %s24_s13, [#allocation3], %s702_s17, %s702_s17, %s703_s18  }
   0x6   :  { %s704_s19 = smov [#allocation6]  }
   0x7   :  { %52 = dma.vmem_to_smem %s50_s16, 16, %s704_s19, [#allocation5]  }
   0x8   :  { %695 = dma.done.wait [#allocation3], 2560  }
   0x9   :  { %696 = vsyncadd [#allocation3], 4294964736 }
   0xa   :  { %697 = dma.done.wait [#allocation5], 16  }
   0xb   :  { %698 = vsyncadd [#allocation5], 4294967280 }
   0xc   :  { %61 = sfence }
   0xd   :  { %v79_v0 = vld [vmem:[#allocation2 + $0x80] sm:$0xf]  ;;  %vm93_vm0 = vcmask 1043456   ;;  %v80_v1 = vld [vmem:[#allocation2 + $0x88] sm:$0xf]  ;;  %v77_v6 = vld [vmem:[#allocation2 + $0x70] sm:$0xff] }
   0xe   :  { %v75_v2 = vld [vmem:[#allocation2 + $0x60] sm:$0xff]  ;;  %591 = vmatpush.msk.msra.mxu0 %vm93_vm0, %v79_v0  ;;  %593 = vmatpush.msk.msra.mxu1 %vm93_vm0, %v80_v1  ;;  %v81_v3 = vld [vmem:[#allocation2 + $0x90] sm:$0xf]  ;;  %v82_v4 = vld [vmem:[#allocation2 + $0x98] sm:$0xf]  ;;  %vm89_vm1 = vcmask 293888  }
   0xf   :  { %v76_v5 = vld [vmem:[#allocation2 + $0x68] sm:$0xff]  ;;  %595 = vmatpush.msk.msra.mxu2 %vm93_vm0, %v81_v3  ;;  %597 = vmatpush.msk.msra.mxu3 %vm93_vm0, %v82_v4  ;;  %v78_v7 = vld [vmem:[#allocation2 + $0x78] sm:$0xff]  ;;  %v71_v8 = vld [vmem:[#allocation2 + $0x40] sm:$0xff]  ;;  %v705_v22 = vmov 0   ;;  %vm192_vm2 = vcmask 31744   ;;  %vm318_vm3 = vcmask 64512  }
  0x10   :  { %118 = vmatpush.msra.mxu0 %v75_v2  ;;  %138 = vmatpush.msra.mxu1 %v76_v5  ;;  %v72_v9 = vld [vmem:[#allocation2 + $0x48] sm:$0xff]  ;;  %v73_v10 = vld [vmem:[#allocation2 + $0x50] sm:$0xff]  ;;  %v74_v11 = vld [vmem:[#allocation2 + $0x58] sm:$0xff]  ;;  %vm509_vm4 = vcmask 1041408   ;;  %s619_s28 = sld [smem:[#allocation6 + $0x1]]  ;;  %vm511_vm5 = vcmask 1045508  }
  0x11   :  { %158 = vmatpush.msra.mxu2 %v77_v6  ;;  %178 = vmatpush.msra.mxu3 %v78_v7  ;;  %v67_v12 = vld [vmem:[#allocation2 + $0x20] sm:$0xff]  ;;  %v68_v13 = vld [vmem:[#allocation2 + $0x28] sm:$0xff]  ;;  %v69_v14 = vld [vmem:[#allocation2 + $0x30] sm:$0xff]  ;;  %s620_s29 = sld [smem:[#allocation6 + $0x2]]  ;;  %s708_s30 = smov [#allocation7]  }
  0x12   :  { %119 = vmatpush.msra.mxu0 %v71_v8  ;;  %139 = vmatpush.msra.mxu1 %v72_v9  ;;  %v70_v15 = vld [vmem:[#allocation2 + $0x38] sm:$0xff]  ;;  %v63_v16 = vld [vmem:[#allocation2] sm:$0xff]  ;;  %v64_v17 = vld [vmem:[#allocation2 + $0x8] sm:$0xff]  ;;  %s578_s10 = sshll.u32 %s708_s30, 4  ;;  %s580_s13 = sshll.u32 %s832_s9, 4  ;;  %s579_s10 = int_to_ptr.vmem [resolvable:$true] %s578_s10  ;;  %s581_s13 = int_to_ptr.hbm [resolvable:$true] %s580_s13 }
  0x13   :  { %159 = vmatpush.msra.mxu2 %v73_v10  ;;  %179 = vmatpush.msra.mxu3 %v74_v11  ;;  %v65_v18 = vld [vmem:[#allocation2 + $0x10] sm:$0xff]  ;;  %v66_v19 = vld [vmem:[#allocation2 + $0x18] sm:$0xff]  ;;  %v191_v38 = vld [vmem:[%s826_s3 + $0x8] sm:$0xff] }
  0x14   :  { %120 = vmatpush.msra.mxu0 %v67_v12  ;;  %140 = vmatpush.msra.mxu1 %v68_v13  ;;  %v62_v20 = vld [vmem:[%s824_s1] sm:$0xf] }
  0x15   :  { %160 = vmatpush.msra.mxu2 %v69_v14  ;;  %180 = vmatpush.msra.mxu3 %v70_v15  ;;  %v83_v21 = vld [vmem:[%s825_s2] sm:$0xf] }
  0x16   :  { %121 = vmatpush.msra.mxu0 %v63_v16  ;;  %141 = vmatpush.msra.mxu1 %v64_v17  ;;  %v303_v23 = vld [vmem:[%s827_s4] sm:$0xff] }
  0x17   :  { %161 = vmatpush.msra.mxu2 %v65_v18  ;;  %181 = vmatpush.msra.mxu3 %v66_v19  ;;  %v190_v31 = vld [vmem:[%s826_s3] sm:$0xff]  ;;  %v706_v18 = vmov 1935823168  }
  0x18   :  { %592 = vmatmul.msk.f32.vlgmr.msra.gmra.mxu0 %vm89_vm1, %v62_v20  ;;  %594 = vmatmul.msk.f32.vlgmr.msra.gmra.mxu1 %vm89_vm1, %v62_v20  ;;  %v402_v39 = vld [vmem:[%s828_s5] sm:$0xff]  ;;  %v516_v19 = vunpack.c.l.s4 %v706_v18 }
  0x19   :  { %596 = vmatmul.msk.f32.vlgmr.msra.gmra.mxu2 %vm89_vm1, %v62_v20  ;;  %598 = vmatmul.msk.f32.vlgmr.msra.gmra.mxu3 %vm89_vm1, %v62_v20  ;;  %v317_v47 = vld [vmem:[%s829_s6] sm:$0xff] }
  0x1a   :  { %629 = vset.pattern.permute.xlu0 %v705_v22  ;;  %630 = vset.pattern.permute.xlu1 %v705_v22  ;;  %v416_v1 = vld [vmem:[%s830_s7] sm:$0x1]  ;;  %s417_s7 = sld [smem:[#allocation6]] }
  0x1b   :  { %86 = vperm.xlu0 %629, %v83_v21   ;;  %405 = vperm.xlu1 %630, %v402_v39  }
  0x20   :  { %v418_v12 = vstv %s417_s7 }
  0x23   :  { %306 = vperm.xlu0 %629, %v303_v23  }
  0x8d   :  { %v87_v24 = vpop.permute.xlu0 %86  ;;  %v406_v56 = vpop.permute.xlu1 %405 }
  0x95   :  { %v123_v25 = vpop.f32.mrf.mxu0  ;;  %v143_v26 = vpop.f32.mrf.mxu1 }
  0x96   :  { %v124_v27 = vadd.f32 %v123_v25, %v87_v24  ;;  %v144_v28 = vadd.f32 %v143_v26, %v87_v24  ;;  %v307_v40 = vpop.permute.xlu0 %306 }
  0x98   :  { %v186_v29 = vmax.f32 %v124_v27, 0.0  ;;  %v187_v30 = vmax.f32 %v144_v28, 0.0  ;;  %v517_v27 = vunpack.c.0.s8 %v516_v19 }
  0x9a   :  { %599 = vmatpush.msk.msrb.mxu0 %vm93_vm0, %v186_v29  ;;  %602 = vmatpush.msk.msrb.mxu1 %vm93_vm0, %v187_v30 }
  0x9b   :  { %600 = vmatmul.msk.f32.vlgmr.msrb.gmra.mxu0 %vm192_vm2, %v190_v31  ;;  %603 = vmatmul.msk.f32.vlgmr.msrb.gmra.mxu1 %vm192_vm2, %v190_v31 }
  0x9c   :  { %v163_v32 = vpop.f32.mrf.mxu2  ;;  %v183_v33 = vpop.f32.mrf.mxu3 }
  0x9d   :  { %v164_v34 = vadd.f32 %v163_v32, %v87_v24  ;;  %v184_v35 = vadd.f32 %v183_v33, %v87_v24  ;;  %v524_v33 = vstv %s620_s29 }
  0x9f   :  { %v188_v36 = vmax.f32 %v164_v34, 0.0  ;;  %v189_v37 = vmax.f32 %v184_v35, 0.0 }
  0xa1   :  { %605 = vmatpush.msk.msrb.mxu2 %vm93_vm0, %v188_v36  ;;  %608 = vmatpush.msk.msrb.mxu3 %vm93_vm0, %v189_v37 }
  0xa2   :  { %606 = vmatmul.msk.f32.vlgmr.msrb.gmra.mxu2 %vm192_vm2, %v190_v31  ;;  %609 = vmatmul.msk.f32.vlgmr.msrb.gmra.mxu3 %vm192_vm2, %v190_v31  ;;  %v521_v31 = vstv %s619_s28 }
  0xa3   :  { %604 = vmatmul.msk.f32.gmra.mxu1 %vm192_vm2, %v191_v38  ;;  %601 = vmatmul.msk.f32.gmra.mxu0 %vm192_vm2, %v191_v38 }
  0xaa   :  { %607 = vmatmul.msk.f32.gmra.mxu2 %vm192_vm2, %v191_v38  ;;  %610 = vmatmul.msk.f32.gmra.mxu3 %vm192_vm2, %v191_v38 }
 0x118   :  { %v228_v41 = vpop.f32.mrf.mxu0  ;;  %v251_v42 = vpop.f32.mrf.mxu1 }
 0x119   :  { %v309_v43 = vadd.f32 %v307_v40, %v228_v41  ;;  %v310_v44 = vadd.f32 %v307_v40, %v251_v42  ;;  %v707_v41 = vmov 839922192  }
 0x11a   :  { %v539_v42 = vunpack.c.l.s4 %v707_v41 }
 0x11b   :  { %v313_v45 = vmax.f32 %v309_v43, 0.0  ;;  %v314_v46 = vmax.f32 %v310_v44, 0.0 }
 0x11c   :  { %v540_v43 = vunpack.c.0.s8 %v539_v42 }
 0x11d   :  { %337 = vmatpush.msra.mxu0 %v313_v45  ;;  %357 = vmatpush.msra.mxu1 %v314_v46 }
 0x11e   :  { %612 = vmatmul.msk.f32.vlgmr.msra.gmra.mxu1 %vm318_vm3, %v317_v47  ;;  %611 = vmatmul.msk.f32.vlgmr.msra.gmra.mxu0 %vm318_vm3, %v317_v47 }
 0x120   :  { %v254_v54 = vpop.f32.mrf.mxu1  ;;  %v231_v55 = vpop.f32.mrf.mxu0 }
 0x125   :  { %v274_v48 = vpop.f32.mrf.mxu2  ;;  %v297_v49 = vpop.f32.mrf.mxu3 }
 0x126   :  { %v311_v50 = vadd.f32 %v307_v40, %v274_v48  ;;  %v312_v51 = vadd.f32 %v307_v40, %v297_v49 }
 0x128   :  { %v315_v52 = vmax.f32 %v311_v50, 0.0  ;;  %v316_v53 = vmax.f32 %v312_v51, 0.0 }
 0x12a   :  { %377 = vmatpush.msra.mxu2 %v315_v52  ;;  %397 = vmatpush.msra.mxu3 %v316_v53 }
 0x12b   :  { %613 = vmatmul.msk.f32.vlgmr.msra.gmra.mxu2 %vm318_vm3, %v317_v47  ;;  %614 = vmatmul.msk.f32.vlgmr.msra.gmra.mxu3 %vm318_vm3, %v317_v47 }
 0x12d   :  { %v277_v2 = vpop.f32.mrf.mxu2  ;;  %v300_v3 = vpop.f32.mrf.mxu3 }
 0x19b   :  { %v359_v57 = vpop.f32.mrf.mxu1  ;;  %v339_v58 = vpop.f32.mrf.mxu0 }
 0x19c   :  { %v360_v59 = vadd.f32 %v359_v57, %v254_v54  ;;  %v340_v60 = vadd.f32 %v339_v58, %v231_v55 }
 0x19e   :  { %v409_v61 = vadd.f32 %v406_v56, %v360_v59  ;;  %v408_v62 = vadd.f32 %v406_v56, %v340_v60 }
 0x1a0   :  { %v413_v63 = vmax.f32 %v409_v61, 0.0  ;;  %v412_v0 = vmax.f32 %v408_v62, 0.0 }
 0x1a2   :  { %457 = vmatpush.msrb.mxu1 %v413_v63  ;;  %437 = vmatpush.msrb.mxu0 %v412_v0 }
 0x1a3   :  { %616 = vmatmul.msk.f32.vlgmr.msrb.gmra.mxu1 %vm318_vm3, %v416_v1  ;;  %615 = vmatmul.msk.f32.vlgmr.msrb.gmra.mxu0 %vm318_vm3, %v416_v1 }
 0x1ae   :  { %v379_v4 = vpop.f32.mrf.mxu2  ;;  %v399_v5 = vpop.f32.mrf.mxu3 }
 0x1af   :  { %v380_v6 = vadd.f32 %v379_v4, %v277_v2  ;;  %v400_v7 = vadd.f32 %v399_v5, %v300_v3 }
 0x1b1   :  { %v410_v8 = vadd.f32 %v406_v56, %v380_v6  ;;  %v411_v9 = vadd.f32 %v406_v56, %v400_v7 }
 0x1b3   :  { %v414_v10 = vmax.f32 %v410_v8, 0.0  ;;  %v415_v11 = vmax.f32 %v411_v9, 0.0 }
 0x1b5   :  { %477 = vmatpush.msrb.mxu2 %v414_v10  ;;  %497 = vmatpush.msrb.mxu3 %v415_v11 }
 0x1b6   :  { %617 = vmatmul.msk.f32.vlgmr.msrb.gmra.mxu2 %vm318_vm3, %v416_v1  ;;  %618 = vmatmul.msk.f32.vlgmr.msrb.gmra.mxu3 %vm318_vm3, %v416_v1 }
 0x220   :  { %v459_v13 = vpop.f32.mrf.mxu1  ;;  %v439_v15 = vpop.f32.mrf.mxu0 }
 0x221   :  { %v460_v14 = vadd.f32 %v459_v13, %v418_v12  ;;  %v440_v17 = vadd.f32 %v439_v15, %v418_v12 }
 0x223   :  { %v506_v16 = vrot.slane %v460_v14, 6 }
 0x225   :  { %v510_v26 = vsel %vm509_vm4, %v440_v17, %v506_v16 }
 0x239   :  { %v479_v20 = vpop.f32.mrf.mxu2  ;;  %v499_v21 = vpop.f32.mrf.mxu3 }
 0x23a   :  { %v480_v22 = vadd.f32 %v479_v20, %v418_v12  ;;  %v500_v23 = vadd.f32 %v499_v21, %v418_v12 }
 0x23c   :  { %v507_v24 = vrot.slane %v480_v22, 4  ;;  %v508_v25 = vrot.slane %v500_v23, 2 }
 0x23e   :  { %v512_v28 = vsel %vm511_vm5, %v507_v24, %v508_v25 }
 0x23f   :  { %v513_v29 = vsel %vm93_vm0, %v510_v26, %v512_v28 }
 0x240   :  { %v518_v30 = vperm.slane %v513_v29, %v517_v27 }
 0x242   :  { %v520_v32 = vmax.f32 %v518_v30, 0.0 }
 0x244   :  { %v522_v34 = vmul.f32 %v521_v31, %v520_v32 }
 0x246   :  { %v525_v35 = vadd.f32 %v524_v33, %v522_v34 }
 0x248   :  { %527 = vst [vmem:[#allocation1] ss:$2 sm:$0xff] %v525_v35 }
 0x24f   :  { %v528_v36 = vld.sshfl [vmem:[#allocation1] sm:$0xff pattern:$0x75316420]  ;;  %v529_v37 = vld.sshfl [vmem:[#allocation1 + $0x8] sm:$0xff pattern:$0x75316420] }
 0x250   :  { %v532_v38 = vsel %vm509_vm4, %v528_v36, -inf  ;;  %v533_v39 = vsel %vm509_vm4, %v529_v37, -inf }
 0x251   :  { %v534_v40 = vmax.f32 %v532_v38, %v533_v39 }
 0x253   :  { %535 = vmax.xlane.f32.xlu1 %v534_v40 }
 0x2c6   :  { %v536_v44 = vpop.xlane.xlu1 %535 }
 0x2c7   :  { %v541_v45 = vperm.slane %v536_v44, %v540_v43 }
 0x2c9   :  { %v543_v46 = vsub.f32 %v525_v35, %v541_v45 }
 0x2cb   :  { %v544_v47 = vmul.f32 1.442695, %v543_v46 }
 0x2cd   :  { %631 = vpow2.f32 %v544_v47 }
 0x2d3   :  { %v632_v48 = vpop.eup %631 }
 0x2d4   :  { %547 = vst [vmem:[#allocation1] ss:$2 sm:$0xff] %v632_v48 }
 0x2db   :  { %v548_v49 = vld.sshfl [vmem:[#allocation1] sm:$0xff pattern:$0x75316420]  ;;  %v549_v50 = vld.sshfl [vmem:[#allocation1 + $0x8] sm:$0xff pattern:$0x75316420] }
 0x2dc   :  { %v552_v51 = vsel %vm509_vm4, %v548_v49, 0.0  ;;  %v553_v52 = vsel %vm509_vm4, %v549_v50, 0.0 }
 0x2dd   :  { %v554_v53 = vadd.f32 %v553_v52, %v552_v51 }
 0x2df   :  { %555 = vadd.xlane.f32.xlu2 %v554_v53 }
 0x352   :  { %v556_v54 = vpop.xlane.xlu2 %555 }
 0x353   :  { %633 = vrcp.f32 %v556_v54 }
 0x359   :  { %v634_v55 = vpop.eup %633 }
 0x35a   :  { %v558_v56 = vmul.f32 %v634_v55, %v556_v54 }
 0x35c   :  { %v559_v57 = vsub.f32 2.0, %v558_v56 }
 0x35e   :  { %v560_v58 = vmul.f32 %v634_v55, %v559_v57 }
 0x360   :  { %v565_v59 = vperm.slane %v560_v58, %v540_v43 }
 0x362   :  { %v567_v60 = vmul.f32 %v632_v48, %v565_v59 }
 0x364   :  { %v569_v61 = vrot.slane %v567_v60, 2 }
 0x366   :  { %v570_v62 = vsel %vm509_vm4, %v567_v60, %v569_v61 }
 0x367   :  { %572 = vst [vmem:[#allocation7] sm:$0xf] %v570_v62 }
 0x368   :  { %583 = dma.vmem_to_hbm [thread:$0]  %s579_s10, 64, %s581_s13, [#allocation4]  }
 0x369   :  { %699 = dma.done.wait [#allocation4], 64  }
 0x36a   :  { %700 = vsyncadd [#allocation4], 4294967232 }
 0x36b   :  { %588 = vsyncpa [#allocation3], 1 }
 0x36c   :  { %589 = vsyncpa [#allocation4], 1 }
 0x36d   :  { %590 = vsyncpa [#allocation5], 1 }

</bundles_post_ra>
